<compile_context>
chip_gen: v6e
topology: v6e:2x2x1
jax: 0.10.0
libtpu: 0.0.40
codegen_flags: <defaults>
</compile_context>

<pallas_src>
import jax
import jax.numpy as jnp
from jax.experimental import pallas as pl
from jax.experimental.pallas import tpu as pltpu

IN_FEATURES = 36 * 36          # 1296
K_PAD = 11 * 128               # 1408, K rounded up to a multiple of 128
OUT_FEATURES = 256
NEG_SLOPE = 0.01               # nn.LeakyReLU default negative_slope
TILE_B_MAX = 512               # batch tile cap (safe for v5e's 16 MiB scoped VMEM)


def _linear_leakyrelu_kernel(x_ref, w_ref, b_ref, o_ref):
    # x_ref: (TILE_B, K_PAD)  w_ref: (K_PAD, 256)  b_ref: (1, 256)  o_ref: (TILE_B, 256)
    y = jnp.dot(x_ref[...], w_ref[...], preferred_element_type=jnp.float32)
    y = y + b_ref[...]
    o_ref[...] = jnp.where(y > 0, y, NEG_SLOPE * y).astype(o_ref.dtype)


def server_shared_model_forward(x, weight, bias, *,
                                compute_dtype=jnp.float32,
                                out_dtype=jnp.float32,
                                tile_b_max=TILE_B_MAX):
    """Forward pass of ServerSharedModel.

    Args:
      x:      (B, C, H, W) or (B, 36*36) float32 input (NCHW, flattened inside).
      weight: (36*36, 256) float32 — transposed PyTorch Linear weight.
      bias:   (256,) float32.
      compute_dtype: dtype of x/weight fed to the MXU (f32 or bf16; accum is f32).
      out_dtype: dtype of the returned activations.
    Returns:
      (B, 256) out_dtype.
    """
    B = x.shape[0]
    x2d = x.reshape(B, -1)                              # nn.Flatten
    assert x2d.shape[1] == IN_FEATURES

    # Zero-pad K -> multiple of 128 (does not change the result).
    x2d = jnp.pad(x2d, ((0, 0), (0, K_PAD - IN_FEATURES))).astype(compute_dtype)
    w = jnp.pad(weight, ((0, K_PAD - IN_FEATURES), (0, 0))).astype(compute_dtype)
    b2d = bias.reshape(1, OUT_FEATURES).astype(jnp.float32)

    # Pick batch tile: whole (8-padded) batch if small, else TILE_B_MAX-row tiles.
    b_pad8 = ((B + 7) // 8) * 8
    tile_b = b_pad8 if b_pad8 <= tile_b_max else tile_b_max
    b_padded = ((B + tile_b - 1) // tile_b) * tile_b
    if b_padded != B:
        x2d = jnp.pad(x2d, ((0, b_padded - B), (0, 0)))  # zero tail rows

    grid = (b_padded // tile_b,)                         # (1,) for small B
    out = pl.pallas_call(
        _linear_leakyrelu_kernel,
        out_shape=jax.ShapeDtypeStruct((b_padded, OUT_FEATURES), out_dtype),
        grid=grid,
        in_specs=[
            pl.BlockSpec((tile_b, K_PAD), lambda i: (i, 0)),        # x: tiled over B
            pl.BlockSpec((K_PAD, OUT_FEATURES), lambda i: (0, 0)),  # weight resident
            pl.BlockSpec((1, OUT_FEATURES), lambda i: (0, 0)),      # bias resident
        ],
        out_specs=pl.BlockSpec((tile_b, OUT_FEATURES), lambda i: (i, 0)),
        compiler_params=pltpu.CompilerParams(
            dimension_semantics=("parallel",)),                     # 2-TC split over B (v7x)
    )(x2d, w, b2d)
    return out[:B]


def init_params(key):
    """Deterministic parameter init (Xavier-uniform weight, zero bias),
    matching the shapes of nn.Linear(36*36, 256)."""
    limit = (6.0 / (IN_FEATURES + OUT_FEATURES)) ** 0.5
    w = jax.random.uniform(
        key, (IN_FEATURES, OUT_FEATURES), jnp.float32, minval=-limit, maxval=limit)
    b = jnp.zeros((OUT_FEATURES,), jnp.float32)
    return w, b


def _reference(x, weight, bias):
    y = x.reshape(x.shape[0], -1) @ weight + bias
    return jnp.where(y > 0, y, NEG_SLOPE * y)


if __name__ == "__main__":
    key = jax.random.PRNGKey(0)
    k_x, k_w, k_x2 = jax.random.split(key, 3)

    weight, bias = init_params(k_w)

    # --- Case 1: small batch, NCHW input, single-step grid, f32 compute ---
    B = 2
    x = jax.random.normal(k_x, (B, 1, 36, 36), jnp.float32)
    out = jax.block_until_ready(server_shared_model_forward(x, weight, bias))
    y_ref = _reference(x, weight, bias)
    assert out.shape == (B, OUT_FEATURES)
    assert jnp.allclose(out, y_ref, atol=1e-4, rtol=1e-4)

    # --- Case 2: B not a multiple of 8 (exercises batch-tail zero padding) ---
    B2 = 10
    x2 = jax.random.normal(k_x2, (B2, 1, 36, 36), jnp.float32)
    out2 = jax.block_until_ready(server_shared_model_forward(x2, weight, bias))
    y_ref2 = _reference(x2, weight, bias)
    assert out2.shape == (B2, OUT_FEATURES)
    assert jnp.allclose(out2, y_ref2, atol=1e-4, rtol=1e-4)

    # --- Case 3: multi-step batch grid (tiny tile cap) ---
    out3 = jax.block_until_ready(
        server_shared_model_forward(x2, weight, bias, tile_b_max=8))
    assert jnp.allclose(out3, y_ref2, atol=1e-4, rtol=1e-4)

    # --- Case 4: bf16 compute path (halves weight DMA; f32 MXU accumulate) ---
    out_bf16 = jax.block_until_ready(
        server_shared_model_forward(x, weight, bias, compute_dtype=jnp.bfloat16))
    assert out_bf16.shape == (B, OUT_FEATURES)
    assert jnp.allclose(out_bf16, y_ref, atol=5e-2, rtol=5e-2)

    print("KERNEL_OK")
</pallas_src>

<mosaic_0001>
module attributes {stable_mosaic.version = 11 : i64} {
  func.func @_linear_leakyrelu_kernel(%arg0: i32, %arg1: memref<8x1408xf32, #tpu.memory_space<vmem>>, %arg2: memref<1408x256xf32, #tpu.memory_space<vmem>>, %arg3: memref<1x256xf32, #tpu.memory_space<vmem>>, %arg4: memref<8x256xf32, #tpu.memory_space<vmem>>) attributes {dimension_semantics = [#tpu.dimension_semantics<parallel>], iteration_bounds = array<i64: 1>, scalar_prefetch = 0 : i64, scratch_operands = 0 : i64, tpu.core_type = #tpu.core_type<tc>, window_params = [{transform_indices = @transform_0, window_bounds = array<i64: 8, 1408>}, {pipeline_mode = #tpu.pipeline_mode<synchronous>, transform_indices = @transform_1, window_bounds = array<i64: 1408, 256>}, {pipeline_mode = #tpu.pipeline_mode<synchronous>, transform_indices = @transform_2, window_bounds = array<i64: 1, 256>}, {transform_indices = @transform_3, window_bounds = array<i64: 8, 256>}]} {
    %c0 = arith.constant 0 : index
    %c0_0 = arith.constant 0 : index
    %0 = vector.load %arg1[%c0, %c0_0] : memref<8x1408xf32, #tpu.memory_space<vmem>>, vector<8x1408xf32>
    %c0_1 = arith.constant 0 : index
    %c0_2 = arith.constant 0 : index
    %1 = vector.load %arg2[%c0_1, %c0_2] : memref<1408x256xf32, #tpu.memory_space<vmem>>, vector<1408x256xf32>
    %cst = arith.constant dense<0.000000e+00> : vector<8x256xf32>
    %2 = tpu.matmul %0, %1, %cst {dimension_numbers = #tpu.dot_dimension_numbers<[1], [0], [0], [1], [0, 0, 1, 1], [], []>} : vector<8x1408xf32>, vector<1408x256xf32>, vector<8x256xf32> -> vector<8x256xf32>
    %c0_3 = arith.constant 0 : index
    %c0_4 = arith.constant 0 : index
    %3 = vector.load %arg3[%c0_3, %c0_4] : memref<1x256xf32, #tpu.memory_space<vmem>>, vector<1x256xf32>
    %4 = vector.broadcast %3 : vector<1x256xf32> to vector<8x256xf32>
    %5 = arith.addf %2, %4 : vector<8x256xf32>
    %cst_5 = arith.constant 0.000000e+00 : f32
    %6 = vector.broadcast %cst_5 : f32 to vector<8x256xf32>
    %7 = arith.cmpf ogt, %5, %6 : vector<8x256xf32>
    %cst_6 = arith.constant 0.00999999977 : f32
    %8 = vector.broadcast %cst_6 : f32 to vector<8x256xf32>
    %9 = arith.mulf %8, %5 : vector<8x256xf32>
    %10 = arith.select %7, %5, %9 : vector<8x256xi1>, vector<8x256xf32>
    %c0_7 = arith.constant 0 : index
    %c0_8 = arith.constant 0 : index
    %11 = vector.load %arg4[%c0_7, %c0_8] : memref<8x256xf32, #tpu.memory_space<vmem>>, vector<8x256xf32>
    tpu.vector_store %arg4[%c0_7, %c0_8], %10 {strides = array<i32>} : memref<8x256xf32, #tpu.memory_space<vmem>>, vector<8x256xf32>,
    return
  }
  func.func @transform_0(%arg0: i32) -> (i32, i32) {
    %c0_i32 = arith.constant 0 : i32
    %c0_i32_0 = arith.constant 0 : i32
    return %arg0, %c0_i32 : i32, i32
  }
  func.func @transform_1(%arg0: i32) -> (i32, i32) {
    %c0_i32 = arith.constant 0 : i32
    %c0_i32_0 = arith.constant 0 : i32
    %c0_i32_1 = arith.constant 0 : i32
    return %c0_i32, %c0_i32_0 : i32, i32
  }
  func.func @transform_2(%arg0: i32) -> (i32, i32) {
    %c0_i32 = arith.constant 0 : i32
    %c0_i32_0 = arith.constant 0 : i32
    %c0_i32_1 = arith.constant 0 : i32
    return %c0_i32, %c0_i32_0 : i32, i32
  }
  func.func @transform_3(%arg0: i32) -> (i32, i32) {
    %c0_i32 = arith.constant 0 : i32
    %c0_i32_0 = arith.constant 0 : i32
    return %arg0, %c0_i32 : i32, i32
  }
}

</mosaic_0001>

<bundles_post_ra>
// kernel: tpu_custom_call.1
= control target key start
LH: loop header
LB: loop body
LE: loop exit
PB: predicated region body
PF: predicated region fallthrough
CT: control target
= control target key end

     0   :  { %8 = vsyncpa [#allocation3], 0  ;;  %s1009_s0 = inlined_call_operand.hbm [shape: f32[8,1408], index: 0, kind: input, shape index: {}]   ;;  %s1010_s1 = inlined_call_operand.hbm [shape: f32[1408,256], index: 1, kind: input, shape index: {}]   ;;  %s1011_s2 = inlined_call_operand.hbm [shape: f32[1,256], index: 2, kind: input, shape index: {}]   ;;  %s1012_s3 = inlined_call_operand.hbm [shape: f32[8,256], index: 3, kind: output, shape index: {}]  }
   0x1   :  { %9 = vsyncpa [#allocation6], 0 }
   0x2   :  { %10 = vsyncpa [#allocation4], 0  ;;  %s970_s12 = smov [#allocation5]  }
   0x3   :  { %s26_s13 = sshll.u32 %s970_s12, 4  ;;  %s27_s13 = int_to_ptr.vmem [resolvable:$true] %s26_s13 }
   0x4   :  { %s892_s14 = scalar_lea.vmem %s27_s13, 45056  ;;  %p897_p1 = scmp.lt.s32.totalorder %s27_s13, %s27_s13 }
   0x5   :  { %p893_p0 = scmp.ne.s32.totalorder %s27_s13, %s892_s14  ;;  %p898_p2 = scmp.lt.s32.totalorder %s892_s14, %s892_s14 }
   0x7   :  { %p899_p3 = por %p898_p2, %p897_p1 }
   0x9   :  { %p900_p4 = pnand %p899_p3, %p893_p0 }
   0xb   :  { %903 = shalt.err (!%p900_p4)
}
   0xc   :  { %s971_s15 = smov 256   ;;  %s972_s16 = smov 16  }
   0xd   :  { %32 = dma.hbm_to_vmem [thread:$0]  %s1010_s1, 45056, %s27_s13, [#allocation6], %s971_s15, %s971_s15, %s972_s16  }
   0xe   :  { %s973_s19 = smov [#allocation2]   ;;  %s974_s21 = smov [#allocation7]  }
   0xf   :  { %s17_s20 = sshll.u32 %s973_s19, 4  ;;  %s39_s22 = sshll.u32 %s974_s21, 4  ;;  %s18_s20 = int_to_ptr.vmem [resolvable:$true] %s17_s20  ;;  %s40_s22 = int_to_ptr.vmem [resolvable:$true] %s39_s22 }
  0x10   :  { %s912_s23 = scalar_lea.vmem %s18_s20, 1408  ;;  %p917_p6 = scmp.lt.s32.totalorder %s18_s20, %s18_s20 }
  0x11   :  { %p913_p5 = scmp.ne.s32.totalorder %s18_s20, %s912_s23  ;;  %p918_p7 = scmp.lt.s32.totalorder %s912_s23, %s912_s23 }
  0x13   :  { %p919_p8 = por %p918_p7, %p917_p6 }
  0x15   :  { %p920_p9 = pnand %p919_p8, %p913_p5 }
  0x17   :  { %923 = shalt.err (!%p920_p9)
}
  0x18   :  { %20 = dma.hbm_to_vmem [thread:$0]  %s1009_s0, 1408, %s18_s20, [#allocation3]  }
  0x19   :  { %s932_s26 = scalar_lea.vmem %s40_s22, 32  ;;  %p937_p11 = scmp.lt.s32.totalorder %s40_s22, %s40_s22 }
  0x1a   :  { %p933_p10 = scmp.ne.s32.totalorder %s40_s22, %s932_s26  ;;  %p938_p12 = scmp.lt.s32.totalorder %s932_s26, %s932_s26 }
  0x1c   :  { %p939_p13 = por %p938_p12, %p937_p11 }
  0x1e   :  { %p940_p0 = pnand %p939_p13, %p933_p10 }
  0x20   :  { %943 = shalt.err (!%p940_p0)
}
  0x21   :  { %42 = dma.hbm_to_vmem [thread:$0]  %s1011_s2, 32, %s40_s22, [#allocation6]  }
  0x22   :  { %964 = dma.done.wait [#allocation3], 1408  }
  0x23   :  { %965 = vsyncadd [#allocation3], 4294965888 }
  0x24   :  { %966 = dma.done.wait [#allocation6], 45088  }
  0x25   :  { %967 = vsyncadd [#allocation6], 4294922208  ;;  %v94_v0 = vld [vmem:[#allocation5 + $0xf8] sm:$0xff]  ;;  %v93_v1 = vld [vmem:[#allocation5 + $0xf0] sm:$0xff]  ;;  %s976_s0 = smov [#allocation8]  }
  0x26   :  { %v92_v2 = vld [vmem:[#allocation5 + $0xe8] sm:$0xff]  ;;  %427 = vmatprep.subr.mxu0 %v94_v0  ;;  %v158_v3 = vld [vmem:[#allocation5 + $0x2f8] sm:$0xff]  ;;  %v91_v4 = vld [vmem:[#allocation5 + $0xe0] sm:$0xff]  ;;  %s867_s2 = sshll.u32 %s976_s0, 4  ;;  %s868_s2 = int_to_ptr.vmem [resolvable:$true] %s867_s2 }
  0x27   :  { %v157_v5 = vld [vmem:[#allocation5 + $0x2f0] sm:$0xff]  ;;  %428 = vmatpush1.msra.mxu0 %v93_v1  ;;  %498 = vmatprep.subr.mxu1 %v158_v3  ;;  %v90_v6 = vld [vmem:[#allocation5 + $0xd8] sm:$0xff]  ;;  %v156_v7 = vld [vmem:[#allocation5 + $0x2e8] sm:$0xff]  ;;  %s944_s28 = scalar_lea.vmem %s868_s2, 256  ;;  %p949_p2 = scmp.lt.s32.totalorder %s868_s2, %s868_s2 }
  0x28   :  { %429 = vmatprep.subr.mxu0 %v92_v2  ;;  %499 = vmatpush1.msra.mxu1 %v157_v5  ;;  %v89_v8 = vld [vmem:[#allocation5 + $0xd0] sm:$0xff]  ;;  %v155_v9 = vld [vmem:[#allocation5 + $0x2e0] sm:$0xff]  ;;  %v154_v10 = vld [vmem:[#allocation5 + $0x2d8] sm:$0xff]  ;;  %p945_p1 = scmp.ne.s32.totalorder %s868_s2, %s944_s28  ;;  %p950_p3 = scmp.lt.s32.totalorder %s944_s28, %s944_s28 }
  0x29   :  { %430 = vmatpush1.msra.mxu0 %v91_v4  ;;  %500 = vmatprep.subr.mxu1 %v156_v7  ;;  %v88_v11 = vld [vmem:[#allocation5 + $0xc8] sm:$0xff]  ;;  %v153_v12 = vld [vmem:[#allocation5 + $0x2d0] sm:$0xff]  ;;  %v87_v13 = vld [vmem:[#allocation5 + $0xc0] sm:$0xff] }
  0x2a   :  { %431 = vmatprep.subr.mxu0 %v90_v6  ;;  %501 = vmatpush1.msra.mxu1 %v155_v9  ;;  %v152_v14 = vld [vmem:[#allocation5 + $0x2c8] sm:$0xff]  ;;  %v86_v15 = vld [vmem:[#allocation5 + $0xb8] sm:$0xff]  ;;  %v151_v16 = vld [vmem:[#allocation5 + $0x2c0] sm:$0xff]  ;;  %p951_p4 = por %p950_p3, %p949_p2 }
  0x2b   :  { %432 = vmatpush1.msra.mxu0 %v89_v8  ;;  %502 = vmatprep.subr.mxu1 %v154_v10  ;;  %v85_v17 = vld [vmem:[#allocation5 + $0xb0] sm:$0xff]  ;;  %v150_v18 = vld [vmem:[#allocation5 + $0x2b8] sm:$0xff]  ;;  %v84_v19 = vld [vmem:[#allocation5 + $0xa8] sm:$0xff] }
  0x2c   :  { %433 = vmatprep.subr.mxu0 %v88_v11  ;;  %503 = vmatpush1.msra.mxu1 %v153_v12  ;;  %v149_v20 = vld [vmem:[#allocation5 + $0x2b0] sm:$0xff]  ;;  %v83_v21 = vld [vmem:[#allocation5 + $0xa0] sm:$0xff]  ;;  %v148_v22 = vld [vmem:[#allocation5 + $0x2a8] sm:$0xff]  ;;  %p952_p5 = pnand %p951_p4, %p945_p1 }
  0x2d   :  { %434 = vmatpush1.msra.mxu0 %v87_v13  ;;  %504 = vmatprep.subr.mxu1 %v152_v14  ;;  %v82_v23 = vld [vmem:[#allocation5 + $0x98] sm:$0xff]  ;;  %v147_v24 = vld [vmem:[#allocation5 + $0x2a0] sm:$0xff]  ;;  %v81_v25 = vld [vmem:[#allocation5 + $0x90] sm:$0xff] }
  0x2e   :  { %435 = vmatprep.subr.mxu0 %v86_v15  ;;  %505 = vmatpush1.msra.mxu1 %v151_v16  ;;  %v146_v26 = vld [vmem:[#allocation5 + $0x298] sm:$0xff]  ;;  %v80_v27 = vld [vmem:[#allocation5 + $0x88] sm:$0xff]  ;;  %v145_v28 = vld [vmem:[#allocation5 + $0x290] sm:$0xff] }
  0x2f   :  { %436 = vmatpush1.msra.mxu0 %v85_v17  ;;  %506 = vmatprep.subr.mxu1 %v150_v18  ;;  %v79_v29 = vld [vmem:[#allocation5 + $0x80] sm:$0xff]  ;;  %v144_v30 = vld [vmem:[#allocation5 + $0x288] sm:$0xff]  ;;  %v78_v31 = vld [vmem:[#allocation5 + $0x78] sm:$0xff] }
  0x30   :  { %437 = vmatprep.subr.mxu0 %v84_v19  ;;  %507 = vmatpush1.msra.mxu1 %v149_v20  ;;  %v143_v32 = vld [vmem:[#allocation5 + $0x280] sm:$0xff]  ;;  %v77_v33 = vld [vmem:[#allocation5 + $0x70] sm:$0xff]  ;;  %v142_v34 = vld [vmem:[#allocation5 + $0x278] sm:$0xff] }
  0x31   :  { %438 = vmatpush1.msra.mxu0 %v83_v21  ;;  %508 = vmatprep.subr.mxu1 %v148_v22  ;;  %v76_v35 = vld [vmem:[#allocation5 + $0x68] sm:$0xff]  ;;  %v141_v36 = vld [vmem:[#allocation5 + $0x270] sm:$0xff]  ;;  %v75_v37 = vld [vmem:[#allocation5 + $0x60] sm:$0xff] }
  0x32   :  { %439 = vmatprep.subr.mxu0 %v82_v23  ;;  %509 = vmatpush1.msra.mxu1 %v147_v24  ;;  %v140_v38 = vld [vmem:[#allocation5 + $0x268] sm:$0xff]  ;;  %v74_v39 = vld [vmem:[#allocation5 + $0x58] sm:$0xff]  ;;  %v139_v40 = vld [vmem:[#allocation5 + $0x260] sm:$0xff] }
  0x33   :  { %440 = vmatpush1.msra.mxu0 %v81_v25  ;;  %510 = vmatprep.subr.mxu1 %v146_v26  ;;  %v73_v41 = vld [vmem:[#allocation5 + $0x50] sm:$0xff]  ;;  %v138_v42 = vld [vmem:[#allocation5 + $0x258] sm:$0xff]  ;;  %v72_v43 = vld [vmem:[#allocation5 + $0x48] sm:$0xff] }
  0x34   :  { %441 = vmatprep.subr.mxu0 %v80_v27  ;;  %511 = vmatpush1.msra.mxu1 %v145_v28  ;;  %v137_v44 = vld [vmem:[#allocation5 + $0x250] sm:$0xff]  ;;  %v71_v45 = vld [vmem:[#allocation5 + $0x40] sm:$0xff]  ;;  %v136_v46 = vld [vmem:[#allocation5 + $0x248] sm:$0xff] }
  0x35   :  { %442 = vmatpush1.msra.mxu0 %v79_v29  ;;  %512 = vmatprep.subr.mxu1 %v144_v30  ;;  %v70_v47 = vld [vmem:[#allocation5 + $0x38] sm:$0xff]  ;;  %v135_v48 = vld [vmem:[#allocation5 + $0x240] sm:$0xff]  ;;  %v69_v49 = vld [vmem:[#allocation5 + $0x30] sm:$0xff] }
  0x36   :  { %443 = vmatprep.subr.mxu0 %v78_v31  ;;  %513 = vmatpush1.msra.mxu1 %v143_v32  ;;  %v134_v50 = vld [vmem:[#allocation5 + $0x238] sm:$0xff]  ;;  %v68_v51 = vld [vmem:[#allocation5 + $0x28] sm:$0xff]  ;;  %v133_v52 = vld [vmem:[#allocation5 + $0x230] sm:$0xff] }
  0x37   :  { %444 = vmatpush1.msra.mxu0 %v77_v33  ;;  %514 = vmatprep.subr.mxu1 %v142_v34  ;;  %v67_v53 = vld [vmem:[#allocation5 + $0x20] sm:$0xff]  ;;  %v132_v54 = vld [vmem:[#allocation5 + $0x228] sm:$0xff]  ;;  %v66_v55 = vld [vmem:[#allocation5 + $0x18] sm:$0xff] }
  0x38   :  { %445 = vmatprep.subr.mxu0 %v76_v35  ;;  %515 = vmatpush1.msra.mxu1 %v141_v36  ;;  %v131_v56 = vld [vmem:[#allocation5 + $0x220] sm:$0xff]  ;;  %v65_v57 = vld [vmem:[#allocation5 + $0x10] sm:$0xff]  ;;  %v130_v58 = vld [vmem:[#allocation5 + $0x218] sm:$0xff] }
  0x39   :  { %446 = vmatpush1.msra.mxu0 %v75_v37  ;;  %516 = vmatprep.subr.mxu1 %v140_v38  ;;  %v64_v59 = vld [vmem:[#allocation5 + $0x8] sm:$0xff]  ;;  %v129_v60 = vld [vmem:[#allocation5 + $0x210] sm:$0xff]  ;;  %v63_v61 = vld [vmem:[#allocation5] sm:$0xff] }
  0x3a   :  { %447 = vmatprep.subr.mxu0 %v74_v39  ;;  %517 = vmatpush1.msra.mxu1 %v139_v40  ;;  %v128_v62 = vld [vmem:[#allocation5 + $0x208] sm:$0xff]  ;;  %v126_v63 = vld [vmem:[#allocation5 + $0x1f8] sm:$0xff]  ;;  %v127_v0 = vld [vmem:[#allocation5 + $0x200] sm:$0xff] }
  0x3b   :  { %448 = vmatpush1.msra.mxu0 %v73_v41  ;;  %518 = vmatprep.subr.mxu1 %v138_v42  ;;  %v125_v1 = vld [vmem:[#allocation5 + $0x1f0] sm:$0xff]  ;;  %v190_v2 = vld [vmem:[#allocation5 + $0x3f8] sm:$0xff]  ;;  %v124_v3 = vld [vmem:[#allocation5 + $0x1e8] sm:$0xff] }
  0x3c   :  { %449 = vmatprep.subr.mxu0 %v72_v43  ;;  %519 = vmatpush1.msra.mxu1 %v137_v44  ;;  %v189_v4 = vld [vmem:[#allocation5 + $0x3f0] sm:$0xff]  ;;  %v123_v5 = vld [vmem:[#allocation5 + $0x1e0] sm:$0xff]  ;;  %v188_v6 = vld [vmem:[#allocation5 + $0x3e8] sm:$0xff] }
  0x3d   :  { %450 = vmatpush1.msra.mxu0 %v71_v45  ;;  %520 = vmatprep.subr.mxu1 %v136_v46  ;;  %v122_v7 = vld [vmem:[#allocation5 + $0x1d8] sm:$0xff]  ;;  %v187_v8 = vld [vmem:[#allocation5 + $0x3e0] sm:$0xff]  ;;  %v121_v9 = vld [vmem:[#allocation5 + $0x1d0] sm:$0xff] }
  0x3e   :  { %451 = vmatprep.subr.mxu0 %v70_v47  ;;  %521 = vmatpush1.msra.mxu1 %v135_v48  ;;  %v186_v10 = vld [vmem:[#allocation5 + $0x3d8] sm:$0xff]  ;;  %v120_v11 = vld [vmem:[#allocation5 + $0x1c8] sm:$0xff]  ;;  %v185_v12 = vld [vmem:[#allocation5 + $0x3d0] sm:$0xff] }
  0x3f   :  { %452 = vmatpush1.msra.mxu0 %v69_v49  ;;  %522 = vmatprep.subr.mxu1 %v134_v50  ;;  %v119_v13 = vld [vmem:[#allocation5 + $0x1c0] sm:$0xff]  ;;  %v184_v14 = vld [vmem:[#allocation5 + $0x3c8] sm:$0xff]  ;;  %v118_v15 = vld [vmem:[#allocation5 + $0x1b8] sm:$0xff] }
  0x40   :  { %453 = vmatprep.subr.mxu0 %v68_v51  ;;  %523 = vmatpush1.msra.mxu1 %v133_v52  ;;  %v183_v16 = vld [vmem:[#allocation5 + $0x3c0] sm:$0xff]  ;;  %v117_v17 = vld [vmem:[#allocation5 + $0x1b0] sm:$0xff]  ;;  %v182_v18 = vld [vmem:[#allocation5 + $0x3b8] sm:$0xff] }
  0x41   :  { %454 = vmatpush1.msra.mxu0 %v67_v53  ;;  %524 = vmatprep.subr.mxu1 %v132_v54  ;;  %v116_v19 = vld [vmem:[#allocation5 + $0x1a8] sm:$0xff]  ;;  %v181_v20 = vld [vmem:[#allocation5 + $0x3b0] sm:$0xff]  ;;  %v115_v21 = vld [vmem:[#allocation5 + $0x1a0] sm:$0xff] }
  0x42   :  { %455 = vmatprep.subr.mxu0 %v66_v55  ;;  %525 = vmatpush1.msra.mxu1 %v131_v56  ;;  %v180_v22 = vld [vmem:[#allocation5 + $0x3a8] sm:$0xff]  ;;  %v114_v23 = vld [vmem:[#allocation5 + $0x198] sm:$0xff]  ;;  %v179_v24 = vld [vmem:[#allocation5 + $0x3a0] sm:$0xff] }
  0x43   :  { %456 = vmatpush1.msra.mxu0 %v65_v57  ;;  %526 = vmatprep.subr.mxu1 %v130_v58  ;;  %v113_v25 = vld [vmem:[#allocation5 + $0x190] sm:$0xff]  ;;  %v178_v26 = vld [vmem:[#allocation5 + $0x398] sm:$0xff]  ;;  %v112_v27 = vld [vmem:[#allocation5 + $0x188] sm:$0xff] }
  0x44   :  { %457 = vmatprep.subr.mxu0 %v64_v59  ;;  %527 = vmatpush1.msra.mxu1 %v129_v60  ;;  %v177_v28 = vld [vmem:[#allocation5 + $0x390] sm:$0xff]  ;;  %v111_v29 = vld [vmem:[#allocation5 + $0x180] sm:$0xff]  ;;  %v176_v30 = vld [vmem:[#allocation5 + $0x388] sm:$0xff] }
  0x45   :  { %458 = vmatpush1.msra.mxu0 %v63_v61  ;;  %528 = vmatprep.subr.mxu1 %v128_v62  ;;  %v110_v31 = vld [vmem:[#allocation5 + $0x178] sm:$0xff]  ;;  %v175_v32 = vld [vmem:[#allocation5 + $0x380] sm:$0xff]  ;;  %v109_v33 = vld [vmem:[#allocation5 + $0x170] sm:$0xff] }
  0x46   :  { %459 = vmatprep.subr.mxu0 %v126_v63  ;;  %529 = vmatpush1.msra.mxu1 %v127_v0  ;;  %v174_v34 = vld [vmem:[#allocation5 + $0x378] sm:$0xff]  ;;  %v108_v35 = vld [vmem:[#allocation5 + $0x168] sm:$0xff]  ;;  %v173_v36 = vld [vmem:[#allocation5 + $0x370] sm:$0xff] }
  0x47   :  { %460 = vmatpush2.msra.mxu0 %v125_v1  ;;  %530 = vmatprep.subr.mxu1 %v190_v2  ;;  %v107_v37 = vld [vmem:[#allocation5 + $0x160] sm:$0xff]  ;;  %v172_v38 = vld [vmem:[#allocation5 + $0x368] sm:$0xff]  ;;  %v106_v39 = vld [vmem:[#allocation5 + $0x158] sm:$0xff] }
  0x48   :  { %461 = vmatprep.subr.mxu0 %v124_v3  ;;  %531 = vmatpush2.msra.mxu1 %v189_v4  ;;  %v171_v40 = vld [vmem:[#allocation5 + $0x360] sm:$0xff]  ;;  %v105_v41 = vld [vmem:[#allocation5 + $0x150] sm:$0xff]  ;;  %v170_v42 = vld [vmem:[#allocation5 + $0x358] sm:$0xff] }
  0x49   :  { %462 = vmatpush2.msra.mxu0 %v123_v5  ;;  %532 = vmatprep.subr.mxu1 %v188_v6  ;;  %v104_v43 = vld [vmem:[#allocation5 + $0x148] sm:$0xff]  ;;  %v169_v44 = vld [vmem:[#allocation5 + $0x350] sm:$0xff]  ;;  %v103_v45 = vld [vmem:[#allocation5 + $0x140] sm:$0xff] }
  0x4a   :  { %463 = vmatprep.subr.mxu0 %v122_v7  ;;  %533 = vmatpush2.msra.mxu1 %v187_v8  ;;  %v168_v46 = vld [vmem:[#allocation5 + $0x348] sm:$0xff]  ;;  %v102_v47 = vld [vmem:[#allocation5 + $0x138] sm:$0xff]  ;;  %v167_v48 = vld [vmem:[#allocation5 + $0x340] sm:$0xff] }
  0x4b   :  { %464 = vmatpush2.msra.mxu0 %v121_v9  ;;  %534 = vmatprep.subr.mxu1 %v186_v10  ;;  %v101_v49 = vld [vmem:[#allocation5 + $0x130] sm:$0xff]  ;;  %v166_v50 = vld [vmem:[#allocation5 + $0x338] sm:$0xff]  ;;  %v100_v51 = vld [vmem:[#allocation5 + $0x128] sm:$0xff] }
  0x4c   :  { %465 = vmatprep.subr.mxu0 %v120_v11  ;;  %535 = vmatpush2.msra.mxu1 %v185_v12  ;;  %v165_v52 = vld [vmem:[#allocation5 + $0x330] sm:$0xff]  ;;  %v99_v53 = vld [vmem:[#allocation5 + $0x120] sm:$0xff]  ;;  %v164_v54 = vld [vmem:[#allocation5 + $0x328] sm:$0xff] }
  0x4d   :  { %466 = vmatpush2.msra.mxu0 %v119_v13  ;;  %536 = vmatprep.subr.mxu1 %v184_v14  ;;  %v98_v55 = vld [vmem:[#allocation5 + $0x118] sm:$0xff]  ;;  %v163_v56 = vld [vmem:[#allocation5 + $0x320] sm:$0xff]  ;;  %v97_v57 = vld [vmem:[#allocation5 + $0x110] sm:$0xff] }
  0x4e   :  { %467 = vmatprep.subr.mxu0 %v118_v15  ;;  %537 = vmatpush2.msra.mxu1 %v183_v16  ;;  %v162_v58 = vld [vmem:[#allocation5 + $0x318] sm:$0xff]  ;;  %v96_v59 = vld [vmem:[#allocation5 + $0x108] sm:$0xff]  ;;  %v53_v60 = vld [vmem:[#allocation2 + $0x8] sm:$0xff] }
  0x4f   :  { %468 = vmatpush2.msra.mxu0 %v117_v17  ;;  %538 = vmatprep.subr.mxu1 %v182_v18  ;;  %v95_v61 = vld [vmem:[#allocation5 + $0x100] sm:$0xff]  ;;  %v161_v62 = vld [vmem:[#allocation5 + $0x310] sm:$0xff]  ;;  %v52_v63 = vld [vmem:[#allocation2] sm:$0xff] }
  0x50   :  { %469 = vmatprep.subr.mxu0 %v116_v19  ;;  %539 = vmatpush2.msra.mxu1 %v181_v20  ;;  %v160_v0 = vld [vmem:[#allocation5 + $0x308] sm:$0xff]  ;;  %v222_v1 = vld [vmem:[#allocation5 + $0x4f8] sm:$0xff]  ;;  %v159_v2 = vld [vmem:[#allocation5 + $0x300] sm:$0xff] }
  0x51   :  { %470 = vmatpush2.msra.mxu0 %v115_v21  ;;  %540 = vmatprep.subr.mxu1 %v180_v22  ;;  %v55_v3 = vld [vmem:[#allocation2 + $0x18] sm:$0xff]  ;;  %v221_v4 = vld [vmem:[#allocation5 + $0x4f0] sm:$0xff]  ;;  %v54_v5 = vld [vmem:[#allocation2 + $0x10] sm:$0xff] }
  0x52   :  { %471 = vmatprep.subr.mxu0 %v114_v23  ;;  %541 = vmatpush2.msra.mxu1 %v179_v24  ;;  %v220_v6 = vld [vmem:[#allocation5 + $0x4e8] sm:$0xff]  ;;  %v286_v7 = vld [vmem:[#allocation5 + $0x6f8] sm:$0xff]  ;;  %v219_v8 = vld [vmem:[#allocation5 + $0x4e0] sm:$0xff] }
  0x53   :  { %472 = vmatpush2.msra.mxu0 %v113_v25  ;;  %542 = vmatprep.subr.mxu1 %v178_v26  ;;  %v285_v9 = vld [vmem:[#allocation5 + $0x6f0] sm:$0xff]  ;;  %v218_v10 = vld [vmem:[#allocation5 + $0x4d8] sm:$0xff]  ;;  %v284_v11 = vld [vmem:[#allocation5 + $0x6e8] sm:$0xff] }
  0x54   :  { %473 = vmatprep.subr.mxu0 %v112_v27  ;;  %543 = vmatpush2.msra.mxu1 %v177_v28  ;;  %v217_v12 = vld [vmem:[#allocation5 + $0x4d0] sm:$0xff]  ;;  %v283_v13 = vld [vmem:[#allocation5 + $0x6e0] sm:$0xff]  ;;  %v216_v14 = vld [vmem:[#allocation5 + $0x4c8] sm:$0xff] }
  0x55   :  { %474 = vmatpush2.msra.mxu0 %v111_v29  ;;  %544 = vmatprep.subr.mxu1 %v176_v30  ;;  %v282_v15 = vld [vmem:[#allocation5 + $0x6d8] sm:$0xff]  ;;  %v215_v16 = vld [vmem:[#allocation5 + $0x4c0] sm:$0xff]  ;;  %v281_v17 = vld [vmem:[#allocation5 + $0x6d0] sm:$0xff] }
  0x56   :  { %475 = vmatprep.subr.mxu0 %v110_v31  ;;  %545 = vmatpush2.msra.mxu1 %v175_v32  ;;  %v214_v18 = vld [vmem:[#allocation5 + $0x4b8] sm:$0xff]  ;;  %v280_v19 = vld [vmem:[#allocation5 + $0x6c8] sm:$0xff]  ;;  %v213_v20 = vld [vmem:[#allocation5 + $0x4b0] sm:$0xff] }
  0x57   :  { %476 = vmatpush2.msra.mxu0 %v109_v33  ;;  %546 = vmatprep.subr.mxu1 %v174_v34  ;;  %v279_v21 = vld [vmem:[#allocation5 + $0x6c0] sm:$0xff]  ;;  %v212_v22 = vld [vmem:[#allocation5 + $0x4a8] sm:$0xff]  ;;  %v278_v23 = vld [vmem:[#allocation5 + $0x6b8] sm:$0xff] }
  0x58   :  { %477 = vmatprep.subr.mxu0 %v108_v35  ;;  %547 = vmatpush2.msra.mxu1 %v173_v36  ;;  %v211_v24 = vld [vmem:[#allocation5 + $0x4a0] sm:$0xff]  ;;  %v277_v25 = vld [vmem:[#allocation5 + $0x6b0] sm:$0xff]  ;;  %v210_v26 = vld [vmem:[#allocation5 + $0x498] sm:$0xff] }
  0x59   :  { %478 = vmatpush2.msra.mxu0 %v107_v37  ;;  %548 = vmatprep.subr.mxu1 %v172_v38  ;;  %v276_v27 = vld [vmem:[#allocation5 + $0x6a8] sm:$0xff]  ;;  %v209_v28 = vld [vmem:[#allocation5 + $0x490] sm:$0xff]  ;;  %v275_v29 = vld [vmem:[#allocation5 + $0x6a0] sm:$0xff] }
  0x5a   :  { %479 = vmatprep.subr.mxu0 %v106_v39  ;;  %549 = vmatpush2.msra.mxu1 %v171_v40  ;;  %v208_v30 = vld [vmem:[#allocation5 + $0x488] sm:$0xff]  ;;  %v274_v31 = vld [vmem:[#allocation5 + $0x698] sm:$0xff]  ;;  %v207_v32 = vld [vmem:[#allocation5 + $0x480] sm:$0xff] }
  0x5b   :  { %480 = vmatpush2.msra.mxu0 %v105_v41  ;;  %550 = vmatprep.subr.mxu1 %v170_v42  ;;  %v273_v33 = vld [vmem:[#allocation5 + $0x690] sm:$0xff]  ;;  %v206_v34 = vld [vmem:[#allocation5 + $0x478] sm:$0xff]  ;;  %v272_v35 = vld [vmem:[#allocation5 + $0x688] sm:$0xff] }
  0x5c   :  { %481 = vmatprep.subr.mxu0 %v104_v43  ;;  %551 = vmatpush2.msra.mxu1 %v169_v44  ;;  %v205_v36 = vld [vmem:[#allocation5 + $0x470] sm:$0xff]  ;;  %v271_v37 = vld [vmem:[#allocation5 + $0x680] sm:$0xff]  ;;  %v204_v38 = vld [vmem:[#allocation5 + $0x468] sm:$0xff] }
  0x5d   :  { %482 = vmatpush2.msra.mxu0 %v103_v45  ;;  %552 = vmatprep.subr.mxu1 %v168_v46  ;;  %v270_v39 = vld [vmem:[#allocation5 + $0x678] sm:$0xff]  ;;  %v203_v40 = vld [vmem:[#allocation5 + $0x460] sm:$0xff]  ;;  %v269_v41 = vld [vmem:[#allocation5 + $0x670] sm:$0xff] }
  0x5e   :  { %483 = vmatprep.subr.mxu0 %v102_v47  ;;  %553 = vmatpush2.msra.mxu1 %v167_v48  ;;  %v202_v42 = vld [vmem:[#allocation5 + $0x458] sm:$0xff]  ;;  %v268_v43 = vld [vmem:[#allocation5 + $0x668] sm:$0xff]  ;;  %v201_v44 = vld [vmem:[#allocation5 + $0x450] sm:$0xff] }
  0x5f   :  { %484 = vmatpush2.msra.mxu0 %v101_v49  ;;  %554 = vmatprep.subr.mxu1 %v166_v50  ;;  %v267_v45 = vld [vmem:[#allocation5 + $0x660] sm:$0xff]  ;;  %v200_v46 = vld [vmem:[#allocation5 + $0x448] sm:$0xff]  ;;  %v266_v47 = vld [vmem:[#allocation5 + $0x658] sm:$0xff] }
  0x60   :  { %485 = vmatprep.subr.mxu0 %v100_v51  ;;  %555 = vmatpush2.msra.mxu1 %v165_v52  ;;  %v199_v48 = vld [vmem:[#allocation5 + $0x440] sm:$0xff]  ;;  %v265_v49 = vld [vmem:[#allocation5 + $0x650] sm:$0xff]  ;;  %v198_v50 = vld [vmem:[#allocation5 + $0x438] sm:$0xff] }
  0x61   :  { %486 = vmatpush2.msra.mxu0 %v99_v53  ;;  %556 = vmatprep.subr.mxu1 %v164_v54  ;;  %v264_v51 = vld [vmem:[#allocation5 + $0x648] sm:$0xff]  ;;  %v197_v52 = vld [vmem:[#allocation5 + $0x430] sm:$0xff]  ;;  %v263_v53 = vld [vmem:[#allocation5 + $0x640] sm:$0xff] }
  0x62   :  { %487 = vmatprep.subr.mxu0 %v98_v55  ;;  %557 = vmatpush2.msra.mxu1 %v163_v56  ;;  %v196_v54 = vld [vmem:[#allocation5 + $0x428] sm:$0xff]  ;;  %v262_v55 = vld [vmem:[#allocation5 + $0x638] sm:$0xff]  ;;  %v195_v56 = vld [vmem:[#allocation5 + $0x420] sm:$0xff] }
  0x63   :  { %488 = vmatpush2.msra.mxu0 %v97_v57  ;;  %558 = vmatprep.subr.mxu1 %v162_v58  ;;  %v261_v57 = vld [vmem:[#allocation5 + $0x630] sm:$0xff]  ;;  %v194_v58 = vld [vmem:[#allocation5 + $0x418] sm:$0xff] }
  0x64   :  { %489 = vmatprep.subr.mxu0 %v96_v59  ;;  %491 = vmatprep.mubr.f32.mxu0 %v53_v60  ;;  %v260_v59 = vld [vmem:[#allocation5 + $0x628] sm:$0xff]  ;;  %v193_v60 = vld [vmem:[#allocation5 + $0x410] sm:$0xff] }
  0x65   :  { %490 = vmatpush2.msra.mxu0 %v95_v61  ;;  %559 = vmatpush2.msra.mxu1 %v161_v62  ;;  %v259_v61 = vld [vmem:[#allocation5 + $0x620] sm:$0xff]  ;;  %v192_v62 = vld [vmem:[#allocation5 + $0x408] sm:$0xff] }
  0x66   :  { %492 = vmatmul.mubr.f32.vlgmr.msra.gmra.mxu0 %v52_v63  ;;  %560 = vmatprep.subr.mxu1 %v160_v0  ;;  %v258_v63 = vld [vmem:[#allocation5 + $0x618] sm:$0xff]  ;;  %v191_v0 = vld [vmem:[#allocation5 + $0x400] sm:$0xff] }
  0x67   :  { %569 = vmatprep.subr.mxu0 %v222_v1  ;;  %561 = vmatpush2.msra.mxu1 %v159_v2  ;;  %v257_v1 = vld [vmem:[#allocation5 + $0x610] sm:$0xff]  ;;  %v254_v2 = vld [vmem:[#allocation5 + $0x5f8] sm:$0xff] }
  0x68   :  { %562 = vmatprep.mubr.f32.mxu1 %v55_v3  ;;  %570 = vmatpush1.msra.mxu0 %v221_v4  ;;  %v256_v3 = vld [vmem:[#allocation5 + $0x608] sm:$0xff]  ;;  %v253_v4 = vld [vmem:[#allocation5 + $0x5f0] sm:$0xff] }
  0x69   :  { %563 = vmatmul.mubr.f32.vlgmr.msra.gmra.mxu1 %v54_v5  ;;  %571 = vmatprep.subr.mxu0 %v220_v6  ;;  %v255_v5 = vld [vmem:[#allocation5 + $0x600] sm:$0xff]  ;;  %v252_v6 = vld [vmem:[#allocation5 + $0x5e8] sm:$0xff] }
  0x6a   :  { %640 = vmatprep.subr.mxu1 %v286_v7  ;;  %572 = vmatpush1.msra.mxu0 %v219_v8  ;;  %v318_v7 = vld [vmem:[#allocation5 + $0x7f8] sm:$0xff]  ;;  %v251_v8 = vld [vmem:[#allocation5 + $0x5e0] sm:$0xff] }
  0x6b   :  { %641 = vmatpush1.msra.mxu1 %v285_v9  ;;  %573 = vmatprep.subr.mxu0 %v218_v10  ;;  %v317_v9 = vld [vmem:[#allocation5 + $0x7f0] sm:$0xff]  ;;  %v250_v10 = vld [vmem:[#allocation5 + $0x5d8] sm:$0xff] }
  0x6c   :  { %642 = vmatprep.subr.mxu1 %v284_v11  ;;  %574 = vmatpush1.msra.mxu0 %v217_v12  ;;  %v316_v11 = vld [vmem:[#allocation5 + $0x7e8] sm:$0xff]  ;;  %v249_v12 = vld [vmem:[#allocation5 + $0x5d0] sm:$0xff] }
  0x6d   :  { %643 = vmatpush1.msra.mxu1 %v283_v13  ;;  %575 = vmatprep.subr.mxu0 %v216_v14  ;;  %v315_v13 = vld [vmem:[#allocation5 + $0x7e0] sm:$0xff]  ;;  %v248_v14 = vld [vmem:[#allocation5 + $0x5c8] sm:$0xff] }
  0x6e   :  { %644 = vmatprep.subr.mxu1 %v282_v15  ;;  %576 = vmatpush1.msra.mxu0 %v215_v16  ;;  %v314_v15 = vld [vmem:[#allocation5 + $0x7d8] sm:$0xff]  ;;  %v247_v16 = vld [vmem:[#allocation5 + $0x5c0] sm:$0xff] }
  0x6f   :  { %645 = vmatpush1.msra.mxu1 %v281_v17  ;;  %577 = vmatprep.subr.mxu0 %v214_v18  ;;  %v313_v17 = vld [vmem:[#allocation5 + $0x7d0] sm:$0xff]  ;;  %v246_v18 = vld [vmem:[#allocation5 + $0x5b8] sm:$0xff] }
  0x70   :  { %646 = vmatprep.subr.mxu1 %v280_v19  ;;  %578 = vmatpush1.msra.mxu0 %v213_v20  ;;  %v312_v19 = vld [vmem:[#allocation5 + $0x7c8] sm:$0xff]  ;;  %v245_v20 = vld [vmem:[#allocation5 + $0x5b0] sm:$0xff] }
  0x71   :  { %647 = vmatpush1.msra.mxu1 %v279_v21  ;;  %579 = vmatprep.subr.mxu0 %v212_v22  ;;  %v311_v21 = vld [vmem:[#allocation5 + $0x7c0] sm:$0xff]  ;;  %v244_v22 = vld [vmem:[#allocation5 + $0x5a8] sm:$0xff] }
  0x72   :  { %648 = vmatprep.subr.mxu1 %v278_v23  ;;  %580 = vmatpush1.msra.mxu0 %v211_v24  ;;  %v310_v23 = vld [vmem:[#allocation5 + $0x7b8] sm:$0xff]  ;;  %v243_v24 = vld [vmem:[#allocation5 + $0x5a0] sm:$0xff] }
  0x73   :  { %649 = vmatpush1.msra.mxu1 %v277_v25  ;;  %581 = vmatprep.subr.mxu0 %v210_v26  ;;  %v309_v25 = vld [vmem:[#allocation5 + $0x7b0] sm:$0xff]  ;;  %v242_v26 = vld [vmem:[#allocation5 + $0x598] sm:$0xff] }
  0x74   :  { %650 = vmatprep.subr.mxu1 %v276_v27  ;;  %582 = vmatpush1.msra.mxu0 %v209_v28  ;;  %v308_v27 = vld [vmem:[#allocation5 + $0x7a8] sm:$0xff]  ;;  %v241_v28 = vld [vmem:[#allocation5 + $0x590] sm:$0xff] }
  0x75   :  { %651 = vmatpush1.msra.mxu1 %v275_v29  ;;  %583 = vmatprep.subr.mxu0 %v208_v30  ;;  %v307_v29 = vld [vmem:[#allocation5 + $0x7a0] sm:$0xff]  ;;  %v240_v30 = vld [vmem:[#allocation5 + $0x588] sm:$0xff] }
  0x76   :  { %652 = vmatprep.subr.mxu1 %v274_v31  ;;  %584 = vmatpush1.msra.mxu0 %v207_v32  ;;  %v306_v31 = vld [vmem:[#allocation5 + $0x798] sm:$0xff]  ;;  %v239_v32 = vld [vmem:[#allocation5 + $0x580] sm:$0xff] }
  0x77   :  { %653 = vmatpush1.msra.mxu1 %v273_v33  ;;  %585 = vmatprep.subr.mxu0 %v206_v34  ;;  %v305_v33 = vld [vmem:[#allocation5 + $0x790] sm:$0xff]  ;;  %v238_v34 = vld [vmem:[#allocation5 + $0x578] sm:$0xff] }
  0x78   :  { %654 = vmatprep.subr.mxu1 %v272_v35  ;;  %586 = vmatpush1.msra.mxu0 %v205_v36  ;;  %v304_v35 = vld [vmem:[#allocation5 + $0x788] sm:$0xff]  ;;  %v237_v36 = vld [vmem:[#allocation5 + $0x570] sm:$0xff] }
  0x79   :  { %655 = vmatpush1.msra.mxu1 %v271_v37  ;;  %587 = vmatprep.subr.mxu0 %v204_v38  ;;  %v303_v37 = vld [vmem:[#allocation5 + $0x780] sm:$0xff]  ;;  %v236_v38 = vld [vmem:[#allocation5 + $0x568] sm:$0xff] }
  0x7a   :  { %656 = vmatprep.subr.mxu1 %v270_v39  ;;  %588 = vmatpush1.msra.mxu0 %v203_v40  ;;  %v302_v39 = vld [vmem:[#allocation5 + $0x778] sm:$0xff]  ;;  %v235_v40 = vld [vmem:[#allocation5 + $0x560] sm:$0xff] }
  0x7b   :  { %657 = vmatpush1.msra.mxu1 %v269_v41  ;;  %589 = vmatprep.subr.mxu0 %v202_v42  ;;  %v301_v41 = vld [vmem:[#allocation5 + $0x770] sm:$0xff]  ;;  %v234_v42 = vld [vmem:[#allocation5 + $0x558] sm:$0xff] }
  0x7c   :  { %658 = vmatprep.subr.mxu1 %v268_v43  ;;  %590 = vmatpush1.msra.mxu0 %v201_v44  ;;  %v300_v43 = vld [vmem:[#allocation5 + $0x768] sm:$0xff]  ;;  %v233_v44 = vld [vmem:[#allocation5 + $0x550] sm:$0xff] }
  0x7d   :  { %659 = vmatpush1.msra.mxu1 %v267_v45  ;;  %591 = vmatprep.subr.mxu0 %v200_v46  ;;  %v299_v45 = vld [vmem:[#allocation5 + $0x760] sm:$0xff]  ;;  %v232_v46 = vld [vmem:[#allocation5 + $0x548] sm:$0xff] }
  0x7e   :  { %660 = vmatprep.subr.mxu1 %v266_v47  ;;  %592 = vmatpush1.msra.mxu0 %v199_v48  ;;  %v298_v47 = vld [vmem:[#allocation5 + $0x758] sm:$0xff]  ;;  %v231_v48 = vld [vmem:[#allocation5 + $0x540] sm:$0xff] }
  0x7f   :  { %661 = vmatpush1.msra.mxu1 %v265_v49  ;;  %593 = vmatprep.subr.mxu0 %v198_v50  ;;  %v297_v49 = vld [vmem:[#allocation5 + $0x750] sm:$0xff]  ;;  %v230_v50 = vld [vmem:[#allocation5 + $0x538] sm:$0xff] }
  0x80   :  { %662 = vmatprep.subr.mxu1 %v264_v51  ;;  %594 = vmatpush1.msra.mxu0 %v197_v52  ;;  %v296_v51 = vld [vmem:[#allocation5 + $0x748] sm:$0xff]  ;;  %v229_v52 = vld [vmem:[#allocation5 + $0x530] sm:$0xff] }
  0x81   :  { %663 = vmatpush1.msra.mxu1 %v263_v53  ;;  %595 = vmatprep.subr.mxu0 %v196_v54  ;;  %v295_v53 = vld [vmem:[#allocation5 + $0x740] sm:$0xff]  ;;  %v228_v54 = vld [vmem:[#allocation5 + $0x528] sm:$0xff] }
  0x82   :  { %664 = vmatprep.subr.mxu1 %v262_v55  ;;  %596 = vmatpush1.msra.mxu0 %v195_v56  ;;  %v294_v55 = vld [vmem:[#allocation5 + $0x738] sm:$0xff]  ;;  %v227_v56 = vld [vmem:[#allocation5 + $0x520] sm:$0xff] }
  0x83   :  { %665 = vmatpush1.msra.mxu1 %v261_v57  ;;  %597 = vmatprep.subr.mxu0 %v194_v58  ;;  %v293_v57 = vld [vmem:[#allocation5 + $0x730] sm:$0xff]  ;;  %v226_v58 = vld [vmem:[#allocation5 + $0x518] sm:$0xff] }
  0x84   :  { %666 = vmatprep.subr.mxu1 %v260_v59  ;;  %598 = vmatpush1.msra.mxu0 %v193_v60  ;;  %v292_v59 = vld [vmem:[#allocation5 + $0x728] sm:$0xff]  ;;  %v225_v60 = vld [vmem:[#allocation5 + $0x510] sm:$0xff] }
  0x85   :  { %667 = vmatpush1.msra.mxu1 %v259_v61  ;;  %599 = vmatprep.subr.mxu0 %v192_v62  ;;  %v291_v61 = vld [vmem:[#allocation5 + $0x720] sm:$0xff]  ;;  %v224_v62 = vld [vmem:[#allocation5 + $0x508] sm:$0xff] }
  0x86   :  { %668 = vmatprep.subr.mxu1 %v258_v63  ;;  %600 = vmatpush1.msra.mxu0 %v191_v0  ;;  %v290_v63 = vld [vmem:[#allocation5 + $0x718] sm:$0xff]  ;;  %v223_v0 = vld [vmem:[#allocation5 + $0x500] sm:$0xff] }
  0x87   :  { %669 = vmatpush1.msra.mxu1 %v257_v1  ;;  %601 = vmatprep.subr.mxu0 %v254_v2  ;;  %v57_v1 = vld [vmem:[#allocation2 + $0x28] sm:$0xff] }
  0x88   :  { %670 = vmatprep.subr.mxu1 %v256_v3  ;;  %602 = vmatpush2.msra.mxu0 %v253_v4  ;;  %v289_v2 = vld [vmem:[#allocation5 + $0x710] sm:$0xff]  ;;  %v56_v3 = vld [vmem:[#allocation2 + $0x20] sm:$0xff] }
  0x89   :  { %671 = vmatpush1.msra.mxu1 %v255_v5  ;;  %603 = vmatprep.subr.mxu0 %v252_v6  ;;  %v288_v4 = vld [vmem:[#allocation5 + $0x708] sm:$0xff]  ;;  %v350_v5 = vld [vmem:[#allocation5 + $0x8f8] sm:$0xff]  ;;  %v287_v6 = vld [vmem:[#allocation5 + $0x700] sm:$0xff] }
  0x8a   :  { %672 = vmatprep.subr.mxu1 %v318_v7  ;;  %604 = vmatpush2.msra.mxu0 %v251_v8  ;;  %v59_v7 = vld [vmem:[#allocation2 + $0x38] sm:$0xff]  ;;  %v349_v8 = vld [vmem:[#allocation5 + $0x8f0] sm:$0xff] }
  0x8b   :  { %673 = vmatpush2.msra.mxu1 %v317_v9  ;;  %605 = vmatprep.subr.mxu0 %v250_v10  ;;  %v58_v9 = vld [vmem:[#allocation2 + $0x30] sm:$0xff]  ;;  %v348_v10 = vld [vmem:[#allocation5 + $0x8e8] sm:$0xff] }
  0x8c   :  { %674 = vmatprep.subr.mxu1 %v316_v11  ;;  %606 = vmatpush2.msra.mxu0 %v249_v12  ;;  %v347_v11 = vld [vmem:[#allocation5 + $0x8e0] sm:$0xff]  ;;  %v414_v12 = vld [vmem:[#allocation5 + $0xaf8] sm:$0xff] }
  0x8d   :  { %675 = vmatpush2.msra.mxu1 %v315_v13  ;;  %607 = vmatprep.subr.mxu0 %v248_v14  ;;  %v346_v13 = vld [vmem:[#allocation5 + $0x8d8] sm:$0xff]  ;;  %v413_v14 = vld [vmem:[#allocation5 + $0xaf0] sm:$0xff] }
  0x8e   :  { %676 = vmatprep.subr.mxu1 %v314_v15  ;;  %608 = vmatpush2.msra.mxu0 %v247_v16  ;;  %v345_v15 = vld [vmem:[#allocation5 + $0x8d0] sm:$0xff]  ;;  %v412_v16 = vld [vmem:[#allocation5 + $0xae8] sm:$0xff] }
  0x8f   :  { %677 = vmatpush2.msra.mxu1 %v313_v17  ;;  %609 = vmatprep.subr.mxu0 %v246_v18  ;;  %v344_v17 = vld [vmem:[#allocation5 + $0x8c8] sm:$0xff]  ;;  %v411_v18 = vld [vmem:[#allocation5 + $0xae0] sm:$0xff] }
  0x90   :  { %678 = vmatprep.subr.mxu1 %v312_v19  ;;  %610 = vmatpush2.msra.mxu0 %v245_v20  ;;  %v343_v19 = vld [vmem:[#allocation5 + $0x8c0] sm:$0xff]  ;;  %v410_v20 = vld [vmem:[#allocation5 + $0xad8] sm:$0xff] }
  0x91   :  { %679 = vmatpush2.msra.mxu1 %v311_v21  ;;  %611 = vmatprep.subr.mxu0 %v244_v22  ;;  %v342_v21 = vld [vmem:[#allocation5 + $0x8b8] sm:$0xff]  ;;  %v409_v22 = vld [vmem:[#allocation5 + $0xad0] sm:$0xff] }
  0x92   :  { %680 = vmatprep.subr.mxu1 %v310_v23  ;;  %612 = vmatpush2.msra.mxu0 %v243_v24  ;;  %v341_v23 = vld [vmem:[#allocation5 + $0x8b0] sm:$0xff]  ;;  %v408_v24 = vld [vmem:[#allocation5 + $0xac8] sm:$0xff] }
  0x93   :  { %681 = vmatpush2.msra.mxu1 %v309_v25  ;;  %613 = vmatprep.subr.mxu0 %v242_v26  ;;  %v340_v25 = vld [vmem:[#allocation5 + $0x8a8] sm:$0xff]  ;;  %v407_v26 = vld [vmem:[#allocation5 + $0xac0] sm:$0xff] }
  0x94   :  { %682 = vmatprep.subr.mxu1 %v308_v27  ;;  %614 = vmatpush2.msra.mxu0 %v241_v28  ;;  %v339_v27 = vld [vmem:[#allocation5 + $0x8a0] sm:$0xff]  ;;  %v406_v28 = vld [vmem:[#allocation5 + $0xab8] sm:$0xff] }
  0x95   :  { %683 = vmatpush2.msra.mxu1 %v307_v29  ;;  %615 = vmatprep.subr.mxu0 %v240_v30  ;;  %v338_v29 = vld [vmem:[#allocation5 + $0x898] sm:$0xff]  ;;  %v405_v30 = vld [vmem:[#allocation5 + $0xab0] sm:$0xff] }
  0x96   :  { %684 = vmatprep.subr.mxu1 %v306_v31  ;;  %616 = vmatpush2.msra.mxu0 %v239_v32  ;;  %v337_v31 = vld [vmem:[#allocation5 + $0x890] sm:$0xff]  ;;  %v404_v32 = vld [vmem:[#allocation5 + $0xaa8] sm:$0xff] }
  0x97   :  { %685 = vmatpush2.msra.mxu1 %v305_v33  ;;  %617 = vmatprep.subr.mxu0 %v238_v34  ;;  %v336_v33 = vld [vmem:[#allocation5 + $0x888] sm:$0xff]  ;;  %v403_v34 = vld [vmem:[#allocation5 + $0xaa0] sm:$0xff] }
  0x98   :  { %686 = vmatprep.subr.mxu1 %v304_v35  ;;  %618 = vmatpush2.msra.mxu0 %v237_v36  ;;  %v335_v35 = vld [vmem:[#allocation5 + $0x880] sm:$0xff]  ;;  %v402_v36 = vld [vmem:[#allocation5 + $0xa98] sm:$0xff] }
  0x99   :  { %687 = vmatpush2.msra.mxu1 %v303_v37  ;;  %619 = vmatprep.subr.mxu0 %v236_v38  ;;  %v334_v37 = vld [vmem:[#allocation5 + $0x878] sm:$0xff]  ;;  %v401_v38 = vld [vmem:[#allocation5 + $0xa90] sm:$0xff] }
  0x9a   :  { %688 = vmatprep.subr.mxu1 %v302_v39  ;;  %620 = vmatpush2.msra.mxu0 %v235_v40  ;;  %v333_v39 = vld [vmem:[#allocation5 + $0x870] sm:$0xff]  ;;  %v400_v40 = vld [vmem:[#allocation5 + $0xa88] sm:$0xff] }
  0x9b   :  { %689 = vmatpush2.msra.mxu1 %v301_v41  ;;  %621 = vmatprep.subr.mxu0 %v234_v42  ;;  %v332_v41 = vld [vmem:[#allocation5 + $0x868] sm:$0xff]  ;;  %v399_v42 = vld [vmem:[#allocation5 + $0xa80] sm:$0xff] }
  0x9c   :  { %690 = vmatprep.subr.mxu1 %v300_v43  ;;  %622 = vmatpush2.msra.mxu0 %v233_v44  ;;  %v331_v43 = vld [vmem:[#allocation5 + $0x860] sm:$0xff]  ;;  %v398_v44 = vld [vmem:[#allocation5 + $0xa78] sm:$0xff] }
  0x9d   :  { %691 = vmatpush2.msra.mxu1 %v299_v45  ;;  %623 = vmatprep.subr.mxu0 %v232_v46  ;;  %v330_v45 = vld [vmem:[#allocation5 + $0x858] sm:$0xff]  ;;  %v397_v46 = vld [vmem:[#allocation5 + $0xa70] sm:$0xff] }
  0x9e   :  { %692 = vmatprep.subr.mxu1 %v298_v47  ;;  %624 = vmatpush2.msra.mxu0 %v231_v48  ;;  %v329_v47 = vld [vmem:[#allocation5 + $0x850] sm:$0xff]  ;;  %v396_v48 = vld [vmem:[#allocation5 + $0xa68] sm:$0xff] }
  0x9f   :  { %693 = vmatpush2.msra.mxu1 %v297_v49  ;;  %625 = vmatprep.subr.mxu0 %v230_v50  ;;  %v328_v49 = vld [vmem:[#allocation5 + $0x848] sm:$0xff]  ;;  %v395_v50 = vld [vmem:[#allocation5 + $0xa60] sm:$0xff] }
  0xa0   :  { %694 = vmatprep.subr.mxu1 %v296_v51  ;;  %626 = vmatpush2.msra.mxu0 %v229_v52  ;;  %v327_v51 = vld [vmem:[#allocation5 + $0x840] sm:$0xff]  ;;  %v394_v52 = vld [vmem:[#allocation5 + $0xa58] sm:$0xff] }
  0xa1   :  { %695 = vmatpush2.msra.mxu1 %v295_v53  ;;  %627 = vmatprep.subr.mxu0 %v228_v54  ;;  %v326_v53 = vld [vmem:[#allocation5 + $0x838] sm:$0xff]  ;;  %v393_v54 = vld [vmem:[#allocation5 + $0xa50] sm:$0xff] }
  0xa2   :  { %696 = vmatprep.subr.mxu1 %v294_v55  ;;  %628 = vmatpush2.msra.mxu0 %v227_v56  ;;  %v325_v55 = vld [vmem:[#allocation5 + $0x830] sm:$0xff]  ;;  %v392_v56 = vld [vmem:[#allocation5 + $0xa48] sm:$0xff] }
  0xa3   :  { %697 = vmatpush2.msra.mxu1 %v293_v57  ;;  %629 = vmatprep.subr.mxu0 %v226_v58  ;;  %v324_v57 = vld [vmem:[#allocation5 + $0x828] sm:$0xff]  ;;  %v391_v58 = vld [vmem:[#allocation5 + $0xa40] sm:$0xff] }
  0xa4   :  { %698 = vmatprep.subr.mxu1 %v292_v59  ;;  %630 = vmatpush2.msra.mxu0 %v225_v60  ;;  %v323_v59 = vld [vmem:[#allocation5 + $0x820] sm:$0xff]  ;;  %v390_v60 = vld [vmem:[#allocation5 + $0xa38] sm:$0xff] }
  0xa5   :  { %699 = vmatpush2.msra.mxu1 %v291_v61  ;;  %631 = vmatprep.subr.mxu0 %v224_v62  ;;  %v322_v61 = vld [vmem:[#allocation5 + $0x818] sm:$0xff]  ;;  %v389_v62 = vld [vmem:[#allocation5 + $0xa30] sm:$0xff] }
  0xa6   :  { %700 = vmatprep.subr.mxu1 %v290_v63  ;;  %632 = vmatpush2.msra.mxu0 %v223_v0  ;;  %v321_v63 = vld [vmem:[#allocation5 + $0x810] sm:$0xff]  ;;  %v388_v0 = vld [vmem:[#allocation5 + $0xa28] sm:$0xff] }
  0xa7   :  { %633 = vmatprep.mubr.f32.mxu0 %v57_v1  ;;  %701 = vmatpush2.msra.mxu1 %v289_v2  ;;  %v320_v1 = vld [vmem:[#allocation5 + $0x808] sm:$0xff]  ;;  %v387_v2 = vld [vmem:[#allocation5 + $0xa20] sm:$0xff] }
  0xa8   :  { %634 = vmatmul.mubr.f32.vlgmr.msra.gmra.mxu0 %v56_v3  ;;  %702 = vmatprep.subr.mxu1 %v288_v4  ;;  %v319_v3 = vld [vmem:[#allocation5 + $0x800] sm:$0xff]  ;;  %v386_v4 = vld [vmem:[#allocation5 + $0xa18] sm:$0xff] }
  0xa9   :  { %711 = vmatprep.subr.mxu0 %v350_v5  ;;  %703 = vmatpush2.msra.mxu1 %v287_v6  ;;  %v382_v5 = vld [vmem:[#allocation5 + $0x9f8] sm:$0xff]  ;;  %v385_v6 = vld [vmem:[#allocation5 + $0xa10] sm:$0xff] }
  0xaa   :  { %704 = vmatprep.mubr.f32.mxu1 %v59_v7  ;;  %712 = vmatpush1.msra.mxu0 %v349_v8  ;;  %v381_v7 = vld [vmem:[#allocation5 + $0x9f0] sm:$0xff]  ;;  %v384_v8 = vld [vmem:[#allocation5 + $0xa08] sm:$0xff] }
  0xab   :  { %705 = vmatmul.mubr.f32.vlgmr.msra.gmra.mxu1 %v58_v9  ;;  %713 = vmatprep.subr.mxu0 %v348_v10  ;;  %v380_v9 = vld [vmem:[#allocation5 + $0x9e8] sm:$0xff]  ;;  %v61_v10 = vld [vmem:[#allocation2 + $0x48] sm:$0xff] }
  0xac   :  { %714 = vmatpush1.msra.mxu0 %v347_v11  ;;  %782 = vmatprep.subr.mxu1 %v414_v12  ;;  %v379_v11 = vld [vmem:[#allocation5 + $0x9e0] sm:$0xff] }
  0xad   :  { %715 = vmatprep.subr.mxu0 %v346_v13  ;;  %783 = vmatpush1.msra.mxu1 %v413_v14  ;;  %v383_v12 = vld [vmem:[#allocation5 + $0xa00] sm:$0xff]  ;;  %v378_v13 = vld [vmem:[#allocation5 + $0x9d8] sm:$0xff]  ;;  %v377_v14 = vld [vmem:[#allocation5 + $0x9d0] sm:$0xff] }
  0xae   :  { %716 = vmatpush1.msra.mxu0 %v345_v15  ;;  %784 = vmatprep.subr.mxu1 %v412_v16  ;;  %v62_v15 = vld [vmem:[#allocation2 + $0x50] sm:$0xff]  ;;  %v376_v16 = vld [vmem:[#allocation5 + $0x9c8] sm:$0xff] }
  0xaf   :  { %717 = vmatprep.subr.mxu0 %v344_v17  ;;  %785 = vmatpush1.msra.mxu1 %v411_v18  ;;  %v375_v17 = vld [vmem:[#allocation5 + $0x9c0] sm:$0xff]  ;;  %v975_v18 = vmov 0.0  }
  0xb0   :  { %718 = vmatpush1.msra.mxu0 %v343_v19  ;;  %786 = vmatprep.subr.mxu1 %v410_v20  ;;  %v374_v19 = vld [vmem:[#allocation5 + $0x9b8] sm:$0xff]  ;;  %v373_v20 = vld [vmem:[#allocation5 + $0x9b0] sm:$0xff] }
  0xb1   :  { %719 = vmatprep.subr.mxu0 %v342_v21  ;;  %787 = vmatpush1.msra.mxu1 %v409_v22  ;;  %v372_v21 = vld [vmem:[#allocation5 + $0x9a8] sm:$0xff]  ;;  %v371_v22 = vld [vmem:[#allocation5 + $0x9a0] sm:$0xff] }
  0xb2   :  { %720 = vmatpush1.msra.mxu0 %v341_v23  ;;  %788 = vmatprep.subr.mxu1 %v408_v24  ;;  %v370_v23 = vld [vmem:[#allocation5 + $0x998] sm:$0xff]  ;;  %v369_v24 = vld [vmem:[#allocation5 + $0x990] sm:$0xff] }
  0xb3   :  { %721 = vmatprep.subr.mxu0 %v340_v25  ;;  %789 = vmatpush1.msra.mxu1 %v407_v26  ;;  %v368_v25 = vld [vmem:[#allocation5 + $0x988] sm:$0xff]  ;;  %v367_v26 = vld [vmem:[#allocation5 + $0x980] sm:$0xff] }
  0xb4   :  { %722 = vmatpush1.msra.mxu0 %v339_v27  ;;  %790 = vmatprep.subr.mxu1 %v406_v28  ;;  %v366_v27 = vld [vmem:[#allocation5 + $0x978] sm:$0xff]  ;;  %v365_v28 = vld [vmem:[#allocation5 + $0x970] sm:$0xff] }
  0xb5   :  { %723 = vmatprep.subr.mxu0 %v338_v29  ;;  %791 = vmatpush1.msra.mxu1 %v405_v30  ;;  %v364_v29 = vld [vmem:[#allocation5 + $0x968] sm:$0xff]  ;;  %v363_v30 = vld [vmem:[#allocation5 + $0x960] sm:$0xff] }
  0xb6   :  { %724 = vmatpush1.msra.mxu0 %v337_v31  ;;  %792 = vmatprep.subr.mxu1 %v404_v32  ;;  %v362_v31 = vld [vmem:[#allocation5 + $0x958] sm:$0xff]  ;;  %v361_v32 = vld [vmem:[#allocation5 + $0x950] sm:$0xff] }
  0xb7   :  { %725 = vmatprep.subr.mxu0 %v336_v33  ;;  %793 = vmatpush1.msra.mxu1 %v403_v34  ;;  %v360_v33 = vld [vmem:[#allocation5 + $0x948] sm:$0xff]  ;;  %v359_v34 = vld [vmem:[#allocation5 + $0x940] sm:$0xff] }
  0xb8   :  { %726 = vmatpush1.msra.mxu0 %v335_v35  ;;  %794 = vmatprep.subr.mxu1 %v402_v36  ;;  %v358_v35 = vld [vmem:[#allocation5 + $0x938] sm:$0xff]  ;;  %v357_v36 = vld [vmem:[#allocation5 + $0x930] sm:$0xff] }
  0xb9   :  { %727 = vmatprep.subr.mxu0 %v334_v37  ;;  %795 = vmatpush1.msra.mxu1 %v401_v38  ;;  %v356_v37 = vld [vmem:[#allocation5 + $0x928] sm:$0xff]  ;;  %v355_v38 = vld [vmem:[#allocation5 + $0x920] sm:$0xff] }
  0xba   :  { %728 = vmatpush1.msra.mxu0 %v333_v39  ;;  %796 = vmatprep.subr.mxu1 %v400_v40  ;;  %v354_v39 = vld [vmem:[#allocation5 + $0x918] sm:$0xff]  ;;  %v353_v40 = vld [vmem:[#allocation5 + $0x910] sm:$0xff] }
  0xbb   :  { %729 = vmatprep.subr.mxu0 %v332_v41  ;;  %797 = vmatpush1.msra.mxu1 %v399_v42  ;;  %v352_v41 = vld [vmem:[#allocation5 + $0x908] sm:$0xff]  ;;  %v351_v42 = vld [vmem:[#allocation5 + $0x900] sm:$0xff] }
  0xbc   :  { %730 = vmatpush1.msra.mxu0 %v331_v43  ;;  %798 = vmatprep.subr.mxu1 %v398_v44  ;;  %v60_v43 = vld [vmem:[#allocation2 + $0x40] sm:$0xff]  ;;  %v417_v44 = vlaneseq }
  0xbd   :  { %731 = vmatprep.subr.mxu0 %v330_v45  ;;  %799 = vmatpush1.msra.mxu1 %v397_v46 }
  0xbe   :  { %732 = vmatpush1.msra.mxu0 %v329_v47  ;;  %800 = vmatprep.subr.mxu1 %v396_v48  ;;  %v418_v45 = vshrl.u32 %v417_v44, 7  ;;  %v415_v47 = vld [vmem:[#allocation7] sm:$0x3] }
  0xbf   :  { %733 = vmatprep.subr.mxu0 %v328_v49  ;;  %801 = vmatpush1.msra.mxu1 %v395_v50 }
  0xc0   :  { %734 = vmatpush1.msra.mxu0 %v327_v51  ;;  %802 = vmatprep.subr.mxu1 %v394_v52  ;;  %v419_v46 = vsub.s32 0, %v418_v45  ;;  %v423_v48 = vsub.s32 1, %v418_v45 }
  0xc1   :  { %735 = vmatprep.subr.mxu0 %v326_v53  ;;  %803 = vmatpush1.msra.mxu1 %v393_v54 }
  0xc2   :  { %736 = vmatpush1.msra.mxu0 %v325_v55  ;;  %804 = vmatprep.subr.mxu1 %v392_v56  ;;  %v420_v50 = vrot.slane %v415_v47, %v419_v46  ;;  %v424_v51 = vrot.slane %v415_v47, %v423_v48 }
  0xc3   :  { %737 = vmatprep.subr.mxu0 %v324_v57  ;;  %805 = vmatpush1.msra.mxu1 %v391_v58 }
  0xc4   :  { %738 = vmatpush1.msra.mxu0 %v323_v59  ;;  %806 = vmatprep.subr.mxu1 %v390_v60 }
  0xc5   :  { %739 = vmatprep.subr.mxu0 %v322_v61  ;;  %807 = vmatpush1.msra.mxu1 %v389_v62 }
  0xc6   :  { %740 = vmatpush1.msra.mxu0 %v321_v63  ;;  %808 = vmatprep.subr.mxu1 %v388_v0 }
  0xc7   :  { %741 = vmatprep.subr.mxu0 %v320_v1  ;;  %809 = vmatpush1.msra.mxu1 %v387_v2 }
  0xc8   :  { %742 = vmatpush1.msra.mxu0 %v319_v3  ;;  %810 = vmatprep.subr.mxu1 %v386_v4 }
  0xc9   :  { %743 = vmatprep.subr.mxu0 %v382_v5  ;;  %811 = vmatpush1.msra.mxu1 %v385_v6 }
  0xca   :  { %744 = vmatpush2.msra.mxu0 %v381_v7  ;;  %812 = vmatprep.subr.mxu1 %v384_v8 }
  0xcb   :  { %745 = vmatprep.subr.mxu0 %v380_v9  ;;  %775 = vmatprep.mubr.f32.mxu0 %v61_v10 }
  0xcc   :  { %746 = vmatpush2.msra.mxu0 %v379_v11  ;;  %813 = vmatpush1.msra.mxu1 %v383_v12 }
  0xcd   :  { %747 = vmatprep.subr.mxu0 %v378_v13  ;;  %846 = vmatprep.mubr.f32.mxu1 %v975_v18 }
  0xce   :  { %748 = vmatpush2.msra.mxu0 %v377_v14  ;;  %847 = vmatmul.mubr.f32.vlgmr.msra.gmra.mxu1 %v62_v15 }
  0xcf   :  { %749 = vmatprep.subr.mxu0 %v376_v16 }
  0xd0   :  { %750 = vmatpush2.msra.mxu0 %v375_v17 }
  0xd1   :  { %751 = vmatprep.subr.mxu0 %v374_v19 }
  0xd2   :  { %752 = vmatpush2.msra.mxu0 %v373_v20 }
  0xd3   :  { %753 = vmatprep.subr.mxu0 %v372_v21 }
  0xd4   :  { %754 = vmatpush2.msra.mxu0 %v371_v22 }
  0xd5   :  { %755 = vmatprep.subr.mxu0 %v370_v23 }
  0xd6   :  { %756 = vmatpush2.msra.mxu0 %v369_v24 }
  0xd7   :  { %757 = vmatprep.subr.mxu0 %v368_v25 }
  0xd8   :  { %758 = vmatpush2.msra.mxu0 %v367_v26 }
  0xd9   :  { %759 = vmatprep.subr.mxu0 %v366_v27 }
  0xda   :  { %760 = vmatpush2.msra.mxu0 %v365_v28 }
  0xdb   :  { %761 = vmatprep.subr.mxu0 %v364_v29 }
  0xdc   :  { %762 = vmatpush2.msra.mxu0 %v363_v30 }
  0xdd   :  { %763 = vmatprep.subr.mxu0 %v362_v31 }
  0xde   :  { %764 = vmatpush2.msra.mxu0 %v361_v32 }
  0xdf   :  { %765 = vmatprep.subr.mxu0 %v360_v33 }
  0xe0   :  { %766 = vmatpush2.msra.mxu0 %v359_v34 }
  0xe1   :  { %767 = vmatprep.subr.mxu0 %v358_v35 }
  0xe2   :  { %768 = vmatpush2.msra.mxu0 %v357_v36 }
  0xe3   :  { %769 = vmatprep.subr.mxu0 %v356_v37 }
  0xe4   :  { %770 = vmatpush2.msra.mxu0 %v355_v38 }
  0xe5   :  { %771 = vmatprep.subr.mxu0 %v354_v39 }
  0xe6   :  { %772 = vmatpush2.msra.mxu0 %v353_v40 }
  0xe7   :  { %773 = vmatprep.subr.mxu0 %v352_v41 }
  0xe8   :  { %774 = vmatpush2.msra.mxu0 %v351_v42 }
  0xe9   :  { %776 = vmatmul.mubr.f32.vlgmr.msra.gmra.mxu0 %v60_v43 }
 0x126   :  { %v493_v49 = vpop.f32.mrf.mxu0 }
 0x127   :  { %v494_v54 = vadd.f32 %v493_v49, %v420_v50 }
 0x128   :  { %v495_v52 = vpop.f32.mrf.mxu0 }
 0x129   :  { %v564_v53 = vpop.f32.mrf.mxu1  ;;  %v496_v56 = vadd.f32 %v495_v52, %v424_v51 }
 0x12a   :  { %v565_v58 = vadd.f32 %v564_v53, %v494_v54 }
 0x12b   :  { %v566_v57 = vpop.f32.mrf.mxu1 }
 0x12c   :  { %v567_v61 = vadd.f32 %v566_v57, %v496_v56 }
 0x168   :  { %v635_v55 = vpop.f32.mrf.mxu0 }
 0x169   :  { %v636_v62 = vadd.f32 %v635_v55, %v565_v58 }
 0x16a   :  { %v637_v59 = vpop.f32.mrf.mxu0 }
 0x16b   :  { %v706_v60 = vpop.f32.mrf.mxu1  ;;  %v638_v63 = vadd.f32 %v637_v59, %v567_v61 }
 0x16c   :  { %v707_v1 = vadd.f32 %v706_v60, %v636_v62 }
 0x16d   :  { %v708_v0 = vpop.f32.mrf.mxu1 }
 0x16e   :  { %v709_v4 = vadd.f32 %v708_v0, %v638_v63 }
 0x18e   :  { %v848_v3 = vpop.f32.mrf.mxu1 }
 0x190   :  { %v850_v9 = vpop.f32.mrf.mxu1 }
 0x1a9   :  { %v777_v2 = vpop.f32.mrf.mxu0 }
 0x1aa   :  { %v778_v5 = vadd.f32 %v777_v2, %v707_v1 }
 0x1ab   :  { %v779_v6 = vpop.f32.mrf.mxu0 }
 0x1ac   :  { %v849_v7 = vadd.f32 %v848_v3, %v778_v5  ;;  %v780_v8 = vadd.f32 %v779_v6, %v709_v4 }
 0x1ae   :  { %vm853_vm0 = vcmp.gt.f32.partialorder %v849_v7, 0.0  ;;  %v855_v10 = vmul.f32 0.01, %v849_v7  ;;  %v851_v11 = vadd.f32 %v850_v9, %v780_v8 }
 0x1b0   :  { %vm854_vm1 = vcmp.gt.f32.partialorder %v851_v11, 0.0  ;;  %v856_v12 = vmul.f32 0.01, %v851_v11  ;;  %v857_v13 = vsel %vm853_vm0, %v849_v7, %v855_v10 }
 0x1b1   :  { %859 = vst [vmem:[#allocation8] sm:$0xff] %v857_v13 }
 0x1b2   :  { %v858_v14 = vsel %vm854_vm1, %v851_v11, %v856_v12 }
 0x1b3   :  { %860 = vst [vmem:[#allocation8 + $0x8] sm:$0xff] %v858_v14 }
 0x1b4   :  { %955 = shalt.err (!%p952_p5)
}
 0x1b5   :  { %870 = dma.vmem_to_hbm [thread:$0]  %s868_s2, 256, %s1012_s3, [#allocation4]  }
 0x1b6   :  { %968 = dma.done.wait [#allocation4], 256  }
 0x1b7   :  { %969 = vsyncadd [#allocation4], 4294967040 }
 0x1b8   :  { %874 = vsyncpa [#allocation3], 1 }
 0x1b9   :  { %875 = vsyncpa [#allocation6], 1 }
 0x1ba   :  { %876 = vsyncpa [#allocation4], 1 }

</bundles_post_ra>
